<compile_context>
chip_gen: v5e
topology: v5e:2x2
jax: 0.10.0
libtpu: 0.0.40
codegen_flags: <defaults>
</compile_context>

<pallas_src>
import functools

import jax
import jax.numpy as jnp
from jax.experimental import pallas as pl
from jax.experimental.pallas import tpu as pltpu

CLAMP_MAGNITUDE = 10.0
_MAX_BATCH_TILE = 4096


def _round_up(x, m):
    return ((x + m - 1) // m) * m


def _num_tensorcores():
    """Best-effort TensorCore count per device (v7x: 2, v5e/v6e: 1)."""
    try:
        kind = jax.devices()[0].device_kind.lower()
    except Exception:  # pragma: no cover
        return 1
    return 2 if ("v7" in kind or "7x" in kind) else 1


def _choose_batch_tile(batch, num_tcs):
    """Generation-aware batch tile.

    1-TC chips (v5e/v6e): one full-array block -- every extra grid step is ~600
    cycles of pure overhead, which exceeds this kernel's per-tile compute.
    2-TC chips (v7x): split roughly evenly into >=2 lane-aligned (x128) tiles so
    the "parallel" grid axis shards across both TensorCores.
    VMEM footprint is tiny at all these sizes (<2 MiB even at the 4096 cap).
    """
    if num_tcs <= 1:
        return min(batch, _MAX_BATCH_TILE)
    half = -(-batch // num_tcs)
    return min(_round_up(max(half, 8), 128), _MAX_BATCH_TILE)


def mlp_reward_kernel(x_ref, w12t_ref, b12_ref, w3_ref, b3_ref, o_ref, *,
                      clamp_magnitude):
    # x block arrives row-major (bt, D) f32; cast to bf16 in-kernel (VPU pack).
    x_bf = x_ref[...].astype(w12t_ref.dtype)
    # Fused first_fc + hidden Linear as an NT matmul: contract the feature dim of
    # both operands -> (H1, bt) with the batch on the lane axis.  bf16 MXU
    # operands, f32 accumulation.
    h = jax.lax.dot_general(
        w12t_ref[...], x_bf,
        dimension_numbers=(((1,), (1,)), ((), ())),
        preferred_element_type=jnp.float32)                    # (H1, bt) f32
    h = jnp.tanh(h + b12_ref[...])                             # bias + tanh in f32
    # last_fc: (1, H1) @ (H1, bt) -> (1, bt).  bf16 operands, f32 accumulation.
    # Batch is on the lane axis, so the store below is a lane-dense row.
    out = jnp.dot(w3_ref[...], h.astype(w3_ref.dtype),
                  preferred_element_type=jnp.float32) + b3_ref[0, 0]
    o_ref[...] = jnp.clip(out, -clamp_magnitude, clamp_magnitude).astype(o_ref.dtype)


def prepare_params(w1, b1, w2, b2, w3, b3, mxu_dtype=jnp.bfloat16):
    """One-time fold + layout prep (hoisted out of the per-call path)."""
    w1 = w1.astype(jnp.float32)
    b1 = b1.astype(jnp.float32).reshape(1, -1)
    w2 = w2.astype(jnp.float32)
    b2 = b2.astype(jnp.float32).reshape(1, -1)
    w12 = w1 @ w2                                      # (D, H1)  exact fold
    b12 = b1 @ w2 + b2                                 # (1, H1)
    w12t = w12.T.astype(mxu_dtype)                     # (H1, D)  bf16 MXU operand
    b12c = b12.reshape(-1, 1)                          # (H1, 1)  f32
    w3r = w3.reshape(1, -1).astype(mxu_dtype)          # (1, H1)  bf16 MXU operand
    b3s = jnp.asarray(b3, jnp.float32).reshape(1, 1)   # SMEM scalar
    return w12t, b12c, w3r, b3s


@functools.partial(jax.jit, static_argnames=("clamp_magnitude", "batch_tile"))
def mlp_reward_folded(x, w12t, b12c, w3r, b3s, clamp_magnitude=CLAMP_MAGNITUDE,
                      batch_tile=None):
    B, D = x.shape
    H1 = w12t.shape[0]

    bt = batch_tile if batch_tile is not None else _choose_batch_tile(B, _num_tensorcores())
    num_tiles = pl.cdiv(B, bt)
    # Multi-tile grids need lane-aligned output tiles; single-tile uses the
    # full-array block (any size is legal there).
    assert num_tiles == 1 or bt % 128 == 0, "multi-tile batch_tile must be a multiple of 128"

    kernel = functools.partial(mlp_reward_kernel, clamp_magnitude=clamp_magnitude)

    out_row = pl.pallas_call(
        kernel,
        out_shape=jax.ShapeDtypeStruct((1, B), jnp.float32),
        grid_spec=pltpu.PrefetchScalarGridSpec(
            num_scalar_prefetch=0,
            grid=(num_tiles,),
            in_specs=[
                pl.BlockSpec((bt, D), lambda i: (i, 0)),            # x row-major tile
                pl.BlockSpec((H1, D), lambda i: (0, 0)),            # W12^T (resident)
                pl.BlockSpec((H1, 1), lambda i: (0, 0)),            # b12   (resident)
                pl.BlockSpec((1, H1), lambda i: (0, 0)),            # W3    (resident)
                pl.BlockSpec(memory_space=pltpu.MemorySpace.SMEM),  # b3 scalar
            ],
            out_specs=pl.BlockSpec((1, bt), lambda i: (0, i)),      # lane-dense row
        ),
        compiler_params=pltpu.CompilerParams(
            dimension_semantics=("parallel",)),
    )(x.astype(jnp.float32), w12t, b12c, w3r, b3s)

    return out_row.reshape(B, 1)


def mlp_reward(x, w1, b1, w2, b2, w3, b3, *, clamp_magnitude=CLAMP_MAGNITUDE):
    """Convenience one-shot path (prefer prepare_params + mlp_reward_folded)."""
    folded = prepare_params(w1, b1, w2, b2, w3, b3)
    return mlp_reward_folded(x, *folded, clamp_magnitude=clamp_magnitude)


def init_params(key, input_dim, hidden_sizes):
    """Deterministic synthetic init (PyTorch-Linear-like uniform fan-in scaling)."""
    h0, h1 = hidden_sizes
    ks = jax.random.split(key, 6)

    def uni(k, shape, fan_in):
        bound = 1.0 / jnp.sqrt(fan_in)
        return jax.random.uniform(k, shape, jnp.float32, -bound, bound)

    w1 = uni(ks[0], (input_dim, h0), input_dim)
    b1 = uni(ks[1], (1, h0), input_dim)
    w2 = uni(ks[2], (h0, h1), h0)
    b2 = uni(ks[3], (1, h1), h0)
    w3 = uni(ks[4], (h1, 1), h1)
    b3 = uni(ks[5], (1, 1), h1)
    return w1, b1, w2, b2, w3, b3


def reference_forward(x, w1, b1, w2, b2, w3, b3, clamp_magnitude=CLAMP_MAGNITUDE):
    """Exact-f32 unfolded spec semantics (mirrors the torch forward)."""
    hi = jax.lax.Precision.HIGHEST
    h0 = jnp.dot(x, w1, precision=hi) + b1
    h1 = jnp.tanh(jnp.dot(h0, w2, precision=hi) + b2)
    out = jnp.dot(h1, w3, precision=hi) + b3
    return jnp.clip(out, -clamp_magnitude, clamp_magnitude)


def matched_reference(x, w1, b1, w2, b2, w3, b3, clamp_magnitude=CLAMP_MAGNITUDE):
    """Pure-JAX model of the kernel numerics: folded weights, bf16 MXU operands,
    f32 accumulation, f32 elementwise path."""
    hi = jax.lax.Precision.HIGHEST
    bf = lambda a: a.astype(jnp.bfloat16).astype(jnp.float32)
    w12 = bf(jnp.dot(w1, w2, precision=hi))
    b12 = jnp.dot(b1, w2, precision=hi) + b2
    h = jnp.tanh(jnp.dot(bf(x), w12, precision=hi) + b12)
    out = jnp.dot(bf(h), bf(w3), precision=hi) + b3
    return jnp.clip(out, -clamp_magnitude, clamp_magnitude)


if __name__ == "__main__":
    key = jax.random.PRNGKey(0)
    k_x, k_p, k_x2 = jax.random.split(key, 3)

    input_dim = 32
    hidden_sizes = (128, 128)
    params = init_params(k_p, input_dim, hidden_sizes)

    # One-time fold, hoisted out of the per-call path (perf review item #1).
    folded = prepare_params(*params)

    # Small batch: single full-array tile (or 1 lane-aligned tile on v7x).
    x_small = jax.random.normal(k_x, (16, input_dim), jnp.float32)
    out_small = jax.block_until_ready(mlp_reward_folded(x_small, *folded))
    assert out_small.shape == (16, 1)

    # Larger, non-aligned batch: exercises the masked tail block / v7x 2-tile split.
    x_big = jax.random.normal(k_x2, (300, input_dim), jnp.float32)
    out_big = jax.block_until_ready(mlp_reward_folded(x_big, *folded))
    assert out_big.shape == (300, 1)

    for x_in, out in ((x_small, out_small), (x_big, out_big)):
        matched = matched_reference(x_in, *params)   # same folding + bf16 rounding
        ref = reference_forward(x_in, *params)       # exact f32 spec semantics
        assert jnp.allclose(out, matched, atol=1e-2, rtol=1e-2), \
            "mismatch vs numerics-matched reference"
        assert jnp.allclose(out, ref, atol=5e-2, rtol=5e-2), \
            "mismatch vs f32 spec reference (bf16 tolerance)"

    print("KERNEL_OK")
</pallas_src>

<mosaic_0001>
module attributes {stable_mosaic.version = 11 : i64} {
  func.func @mlp_reward_kernel(%arg0: i32, %arg1: memref<16x32xf32, #tpu.memory_space<vmem>>, %arg2: memref<128x32xbf16, #tpu.memory_space<vmem>>, %arg3: memref<128x1xf32, #tpu.memory_space<vmem>>, %arg4: memref<1x128xbf16, #tpu.memory_space<vmem>>, %arg5: memref<1x1xf32, #tpu.memory_space<smem>>, %arg6: memref<1x16xf32, #tpu.memory_space<vmem>>) attributes {dimension_semantics = [#tpu.dimension_semantics<parallel>], iteration_bounds = array<i64: 1>, scalar_prefetch = 0 : i64, scratch_operands = 0 : i64, tpu.core_type = #tpu.core_type<tc>, window_params = [{transform_indices = @transform_0, window_bounds = array<i64: 16, 32>}, {pipeline_mode = #tpu.pipeline_mode<synchronous>, transform_indices = @transform_1, window_bounds = array<i64: 128, 32>}, {pipeline_mode = #tpu.pipeline_mode<synchronous>, transform_indices = @transform_2, window_bounds = array<i64: 128, 1>}, {pipeline_mode = #tpu.pipeline_mode<synchronous>, transform_indices = @transform_3, window_bounds = array<i64: 1, 128>}, {transform_indices = @transform_4, window_bounds = array<i64: 1, 1>}, {transform_indices = @transform_5, window_bounds = array<i64: 1, 16>}]} {
    %c0 = arith.constant 0 : index
    %c0_0 = arith.constant 0 : index
    %0 = vector.load %arg1[%c0, %c0_0] : memref<16x32xf32, #tpu.memory_space<vmem>>, vector<16x32xf32>
    %1 = arith.truncf %0 : vector<16x32xf32> to vector<16x32xbf16>
    %c0_1 = arith.constant 0 : index
    %c0_2 = arith.constant 0 : index
    %2 = vector.load %arg2[%c0_1, %c0_2] : memref<128x32xbf16, #tpu.memory_space<vmem>>, vector<128x32xbf16>
    %cst = arith.constant dense<0.000000e+00> : vector<128x16xf32>
    %3 = tpu.matmul %2, %1, %cst {dimension_numbers = #tpu.dot_dimension_numbers<[1], [1], [0], [0], [0, 0, 1, 0], [], []>} : vector<128x32xbf16>, vector<16x32xbf16>, vector<128x16xf32> -> vector<128x16xf32>
    %c0_3 = arith.constant 0 : index
    %c0_4 = arith.constant 0 : index
    %4 = vector.load %arg3[%c0_3, %c0_4] : memref<128x1xf32, #tpu.memory_space<vmem>>, vector<128x1xf32>
    %5 = vector.broadcast %4 : vector<128x1xf32> to vector<128x16xf32>
    %6 = arith.addf %3, %5 : vector<128x16xf32>
    %7 = math.tanh %6 : vector<128x16xf32>
    %c0_5 = arith.constant 0 : index
    %c0_6 = arith.constant 0 : index
    %8 = vector.load %arg4[%c0_5, %c0_6] : memref<1x128xbf16, #tpu.memory_space<vmem>>, vector<1x128xbf16>
    %9 = arith.truncf %7 : vector<128x16xf32> to vector<128x16xbf16>
    %cst_7 = arith.constant dense<0.000000e+00> : vector<1x16xf32>
    %10 = tpu.matmul %8, %9, %cst_7 {dimension_numbers = #tpu.dot_dimension_numbers<[1], [0], [0], [1], [0, 0, 1, 1], [], []>} : vector<1x128xbf16>, vector<128x16xbf16>, vector<1x16xf32> -> vector<1x16xf32>
    %c0_8 = arith.constant 0 : index
    %c0_9 = arith.constant 0 : index
    %11 = memref.load %arg5[%c0_8, %c0_9] : memref<1x1xf32, #tpu.memory_space<smem>>
    %12 = vector.broadcast %11 : f32 to vector<1x16xf32>
    %13 = arith.addf %10, %12 : vector<1x16xf32>
    %cst_10 = arith.constant -1.000000e+01 : f32
    %cst_11 = arith.constant 1.000000e+01 : f32
    %14 = vector.broadcast %cst_10 : f32 to vector<1x16xf32>
    %15 = arith.maximumf %14, %13 : vector<1x16xf32>
    %16 = vector.broadcast %cst_11 : f32 to vector<1x16xf32>
    %17 = arith.minimumf %16, %15 : vector<1x16xf32>
    %c0_12 = arith.constant 0 : index
    %c0_13 = arith.constant 0 : index
    %18 = vector.load %arg6[%c0_12, %c0_13] : memref<1x16xf32, #tpu.memory_space<vmem>>, vector<1x16xf32>
    tpu.vector_store %arg6[%c0_12, %c0_13], %17 {strides = array<i32>} : memref<1x16xf32, #tpu.memory_space<vmem>>, vector<1x16xf32>,
    return
  }
  func.func @transform_0(%arg0: i32) -> (i32, i32) {
    %c0_i32 = arith.constant 0 : i32
    %c0_i32_0 = arith.constant 0 : i32
    return %arg0, %c0_i32 : i32, i32
  }
  func.func @transform_1(%arg0: i32) -> (i32, i32) {
    %c0_i32 = arith.constant 0 : i32
    %c0_i32_0 = arith.constant 0 : i32
    %c0_i32_1 = arith.constant 0 : i32
    return %c0_i32, %c0_i32_0 : i32, i32
  }
  func.func @transform_2(%arg0: i32) -> (i32, i32) {
    %c0_i32 = arith.constant 0 : i32
    %c0_i32_0 = arith.constant 0 : i32
    %c0_i32_1 = arith.constant 0 : i32
    return %c0_i32, %c0_i32_0 : i32, i32
  }
  func.func @transform_3(%arg0: i32) -> (i32, i32) {
    %c0_i32 = arith.constant 0 : i32
    %c0_i32_0 = arith.constant 0 : i32
    %c0_i32_1 = arith.constant 0 : i32
    return %c0_i32, %c0_i32_0 : i32, i32
  }
  func.func @transform_4(%arg0: i32) -> (i32, i32) {
    %c0_i32 = arith.constant 0 : i32
    %c0_i32_0 = arith.constant 0 : i32
    %c0_i32_1 = arith.constant 0 : i32
    return %c0_i32, %c0_i32_0 : i32, i32
  }
  func.func @transform_5(%arg0: i32) -> (i32, i32) {
    %c0_i32 = arith.constant 0 : i32
    %c0_i32_0 = arith.constant 0 : i32
    return %c0_i32, %arg0 : i32, i32
  }
}

</mosaic_0001>

<bundles_post_ra>
// kernel: mlp_reward_folded.1
= control target key start
LH: loop header
LB: loop body
LE: loop exit
PB: predicated region body
PF: predicated region fallthrough
CT: control target
= control target key end

     0   :  { %vm178_vm0 = vcmask 261120   ;;  %v429_v3 = vmov 0   ;;  %s563_s0 = inlined_call_operand.vmem [shape: f32[16,32], index: 0, kind: input, shape index: {}]   ;;  %s564_s1 = inlined_call_operand.vmem [shape: bf16[128,32], index: 1, kind: input, shape index: {}]   ;;  %s565_s2 = inlined_call_operand.vmem [shape: f32[128,1], index: 2, kind: input, shape index: {}]   ;;  %s566_s3 = inlined_call_operand.vmem [shape: bf16[1,128], index: 3, kind: input, shape index: {}]   ;;  %s567_s4 = inlined_call_operand.<no memory space> [shape: f32[1,1], index: 4, kind: input, shape index: {}]   ;;  %s568_s5 = inlined_call_operand.hbm [shape: f32[1,16], index: 5, kind: output, shape index: {}]  }
   0x1   :  { %v56_v0 = vld [vmem:[%s565_s2 + $0x70] sm:$0xff]  ;;  %v23_v1 = vld [vmem:[%s563_s0] sm:$0xff]  ;;  %v24_v2 = vld [vmem:[%s563_s0 + $0x8] sm:$0xff]  ;;  %368 = vset.pattern.permute.xlu0 %v429_v3  ;;  %369 = vset.pattern.permute.xlu1 %v429_v3 }
   0x2   :  { %v25_v4 = vpack.c.bf16 %v24_v2, %v23_v1  ;;  %130 = vperm.xlu0 %368, %v56_v0   ;;  %v54_v5 = vld [vmem:[%s565_s2 + $0x60] sm:$0xff]  ;;  %370 = vset.pattern.permute.xlu2 %v429_v3  ;;  %v52_v7 = vld [vmem:[%s565_s2 + $0x50] sm:$0xff] }
   0x3   :  { %120 = vperm.xlu1 %369, %v54_v5   ;;  %110 = vperm.xlu2 %370, %v52_v7  }
   0x4   :  { %v204_v6 = vsel %vm178_vm0, %v25_v4, 0 }
   0x5   :  { %213 = vmatpush.bf16.xpose.msra.mxu0 %v204_v6  ;;  %364 = vmatpush.bf16.xpose.msra.mxu2 %v204_v6 }
   0x6   :  { %365 = vmatpush.bf16.xpose.msra.mxu3 %v204_v6 }
   0x7   :  { %11 = vsyncpa [#allocation4], 0  ;;  %v57_v8 = vld [vmem:[%s565_s2 + $0x78] sm:$0xff]  ;;  %v356_v9 = vld [vmem:[%s564_s1] sm:$0xff]  ;;  %s430_s20 = smov [#allocation3]   ;;  %s306_s24 = sshll.u32 %s568_s5, 4  ;;  %s307_s24 = int_to_ptr.hbm [resolvable:$true] %s306_s24 }
   0x8   :  { %v359_v10 = vld [vmem:[%s564_s1 + $0x18] sm:$0xff]  ;;  %v362_v11 = vld [vmem:[%s564_s1 + $0x30] sm:$0xff]  ;;  %v55_v12 = vld [vmem:[%s565_s2 + $0x68] sm:$0xff]  ;;  %s304_s21 = sshll.u32 %s430_s20, 4  ;;  %vm297_vm1 = vcmask 122880   ;;  %s305_s21 = int_to_ptr.vmem [resolvable:$true] %s304_s21 }
   0x9   :  { %v53_v13 = vld [vmem:[%s565_s2 + $0x58] sm:$0xff]  ;;  %v50_v14 = vld [vmem:[%s565_s2 + $0x40] sm:$0xff]  ;;  %v51_v15 = vld [vmem:[%s565_s2 + $0x48] sm:$0xff] }
   0xa   :  { %135 = vperm.xlu0 %368, %v57_v8   ;;  %v48_v16 = vld [vmem:[%s565_s2 + $0x30] sm:$0xff]  ;;  %v49_v17 = vld [vmem:[%s565_s2 + $0x38] sm:$0xff]  ;;  %v357_v18 = vld [vmem:[%s564_s1 + $0x8] sm:$0xff] }
   0xb   :  { %125 = vperm.xlu1 %369, %v55_v12   ;;  %115 = vperm.xlu2 %370, %v53_v13   ;;  %v360_v19 = vld [vmem:[%s564_s1 + $0x20] sm:$0xff]  ;;  %v363_v20 = vld [vmem:[%s564_s1 + $0x38] sm:$0xff]  ;;  %v47_v22 = vld [vmem:[%s565_s2 + $0x28] sm:$0xff] }
   0xc   :  { %347 = vmatmul.msk.bf16.vlgmr.msra.gmra.mxu0 %vm178_vm0, %v356_v9  ;;  %350 = vmatmul.msk.bf16.vlgmr.msra.gmra.mxu2 %vm178_vm0, %v359_v10  ;;  %v46_v21 = vld [vmem:[%s565_s2 + $0x20] sm:$0xff]  ;;  %v44_v23 = vld [vmem:[%s565_s2 + $0x10] sm:$0xff]  ;;  %v45_v24 = vld [vmem:[%s565_s2 + $0x18] sm:$0xff] }
   0xd   :  { %353 = vmatmul.msk.bf16.vlgmr.msra.gmra.mxu3 %vm178_vm0, %v362_v11  ;;  %v42_v25 = vld [vmem:[%s565_s2] sm:$0xff]  ;;  %v43_v26 = vld [vmem:[%s565_s2 + $0x8] sm:$0xff]  ;;  %v358_v27 = vld [vmem:[%s564_s1 + $0x10] sm:$0xff] }
   0xe   :  { %v361_v28 = vld [vmem:[%s564_s1 + $0x28] sm:$0xff] }
  0x12   :  { %100 = vperm.xlu0 %368, %v50_v14  }
  0x13   :  { %105 = vperm.xlu1 %369, %v51_v15   ;;  %90 = vperm.xlu2 %370, %v48_v16  }
  0x1a   :  { %95 = vperm.xlu0 %368, %v49_v17  }
  0x1b   :  { %80 = vperm.xlu1 %369, %v46_v21   ;;  %85 = vperm.xlu2 %370, %v47_v22  }
  0x1c   :  { %348 = vmatmul.msk.bf16.gmra.mxu0 %vm178_vm0, %v357_v18  ;;  %351 = vmatmul.msk.bf16.gmra.mxu2 %vm178_vm0, %v360_v19 }
  0x1d   :  { %354 = vmatmul.msk.bf16.gmra.mxu3 %vm178_vm0, %v363_v20 }
  0x22   :  { %70 = vperm.xlu0 %368, %v44_v23  }
  0x23   :  { %75 = vperm.xlu1 %369, %v45_v24   ;;  %60 = vperm.xlu2 %370, %v42_v25  }
  0x2a   :  { %65 = vperm.xlu0 %368, %v43_v26  }
  0x2c   :  { %349 = vmatmul.msk.bf16.gmra.mxu0 %vm178_vm0, %v358_v27  ;;  %352 = vmatmul.msk.bf16.gmra.mxu2 %vm178_vm0, %v361_v28 }
  0x5d   :  { %v111_v38 = vpop.permute.xlu2 %110 }
  0x65   :  { %v116_v48 = vpop.permute.xlu2 %115 }
  0x6d   :  { %v91_v60 = vpop.permute.xlu2 %90 }
  0x74   :  { %v131_v32 = vpop.permute.xlu0 %130 }
  0x75   :  { %v121_v36 = vpop.permute.xlu1 %120  ;;  %v86_v7 = vpop.permute.xlu2 %85 }
  0x7c   :  { %v136_v37 = vpop.permute.xlu0 %135 }
  0x7d   :  { %v126_v42 = vpop.permute.xlu1 %125  ;;  %v61_v23 = vpop.permute.xlu2 %60 }
  0x84   :  { %v101_v44 = vpop.permute.xlu0 %100 }
  0x85   :  { %v106_v52 = vpop.permute.xlu1 %105 }
  0x89   :  { %v548_v29 = vpop.f32.mrf.mxu0 }
  0x8a   :  { %v216_v28 = vadd.f32 %v548_v29, %v61_v23  ;;  %v281_v29 = vstv %s567_s4 }
  0x8c   :  { %v96_v56 = vpop.permute.xlu0 %95 }
  0x8d   :  { %v81_v0 = vpop.permute.xlu1 %80 }
  0x8f   :  { %v230_v30 = vpop.f32.mrf.mxu2 }
  0x90   :  { %v245_v31 = vpop.f32.mrf.mxu3  ;;  %v231_v9 = vadd.f32 %v230_v30, %v91_v60 }
  0x91   :  { %v550_v33 = vpop.f32.mrf.mxu0  ;;  %v246_v46 = vadd.f32 %v245_v31, %v121_v36 }
  0x94   :  { %v71_v5 = vpop.permute.xlu0 %70 }
  0x95   :  { %v76_v13 = vpop.permute.xlu1 %75 }
  0x97   :  { %v232_v34 = vpop.f32.mrf.mxu2 }
  0x98   :  { %v247_v35 = vpop.f32.mrf.mxu3  ;;  %v233_v6 = vadd.f32 %v232_v34, %v96_v56 }
  0x99   :  { %v220_v39 = vpop.f32.mrf.mxu0  ;;  %v248_v49 = vadd.f32 %v247_v35, %v126_v42 }
  0x9a   :  { %v221_v17 = vadd.f32 %v220_v39, %v71_v5 }
  0x9c   :  { %v66_v20 = vpop.permute.xlu0 %65 }
  0x9d   :  { %v218_v25 = vadd.f32 %v550_v33, %v66_v20  ;;  %v271_v33 = vld [vmem:[%s566_s3] sm:$0x1] }
  0x9f   :  { %v235_v40 = vpop.f32.mrf.mxu2 }
  0xa0   :  { %v250_v41 = vpop.f32.mrf.mxu3  ;;  %v236_v4 = vadd.f32 %v235_v40, %v101_v44 }
  0xa1   :  { %v251_v43 = vadd.f32 %v250_v41, %v131_v32  ;;  %v222_v50 = vpop.f32.mrf.mxu0 }
  0xa2   :  { %v223_v19 = vadd.f32 %v222_v50, %v76_v13 }
  0xa3   :  { %371 = vtanh.f32 %v251_v43 }
  0xa7   :  { %v237_v45 = vpop.f32.mrf.mxu2 }
  0xa8   :  { %v252_v47 = vpop.f32.mrf.mxu3  ;;  %v238_v2 = vadd.f32 %v237_v45, %v106_v52 }
  0xa9   :  { %v253_v51 = vadd.f32 %v252_v47, %v136_v37  ;;  %v372_v54 = vpop.eup %371  ;;  %v225_v61 = vpop.f32.mrf.mxu0 }
  0xaa   :  { %v226_v16 = vadd.f32 %v225_v61, %v81_v0 }
  0xab   :  { %373 = vtanh.f32 %v253_v51 }
  0xac   :  { %375 = vtanh.f32 %v246_v46 }
  0xad   :  { %377 = vtanh.f32 %v248_v49 }
  0xaf   :  { %v240_v53 = vpop.f32.mrf.mxu2 }
  0xb0   :  { %v241_v62 = vadd.f32 %v240_v53, %v111_v38 }
  0xb1   :  { %v374_v55 = vpop.eup %373  ;;  %v227_v8 = vpop.f32.mrf.mxu0 }
  0xb2   :  { %v376_v57 = vpop.eup %375  ;;  %v279_v58 = vpack.c.bf16 %v374_v55, %v372_v54  ;;  %379 = vtanh.f32 %v241_v62  ;;  %v228_v12 = vadd.f32 %v227_v8, %v86_v7 }
  0xb3   :  { %v378_v59 = vpop.eup %377 }
  0xb4   :  { %282 = vmatpush.bf16.msra.mxu1 %v279_v58  ;;  %v278_v63 = vpack.c.bf16 %v378_v59, %v376_v57 }
  0xb7   :  { %v242_v1 = vpop.f32.mrf.mxu2 }
  0xb8   :  { %v243_v3 = vadd.f32 %v242_v1, %v116_v48  ;;  %283 = vmatpush.bf16.msra.mxu1 %v278_v63  ;;  %v380_v10 = vpop.eup %379 }
  0xba   :  { %381 = vtanh.f32 %v243_v3 }
  0xbb   :  { %383 = vtanh.f32 %v238_v2 }
  0xbc   :  { %385 = vtanh.f32 %v236_v4 }
  0xbd   :  { %387 = vtanh.f32 %v233_v6 }
  0xbe   :  { %389 = vtanh.f32 %v231_v9 }
  0xbf   :  { %391 = vtanh.f32 %v228_v12 }
  0xc0   :  { %v382_v11 = vpop.eup %381  ;;  %393 = vtanh.f32 %v226_v16 }
  0xc1   :  { %v277_v14 = vpack.c.bf16 %v382_v11, %v380_v10  ;;  %v384_v15 = vpop.eup %383  ;;  %395 = vtanh.f32 %v221_v17 }
  0xc2   :  { %v386_v18 = vpop.eup %385  ;;  %397 = vtanh.f32 %v223_v19 }
  0xc3   :  { %284 = vmatpush.bf16.msra.mxu1 %v277_v14  ;;  %v276_v21 = vpack.c.bf16 %v384_v15, %v386_v18  ;;  %v388_v22 = vpop.eup %387  ;;  %399 = vtanh.f32 %v218_v25 }
  0xc4   :  { %v390_v24 = vpop.eup %389  ;;  %401 = vtanh.f32 %v216_v28 }
  0xc5   :  { %v275_v26 = vpack.c.bf16 %v388_v22, %v390_v24  ;;  %v392_v27 = vpop.eup %391 }
  0xc6   :  { %v394_v30 = vpop.eup %393 }
  0xc7   :  { %285 = vmatpush.bf16.msra.mxu1 %v276_v21  ;;  %v396_v31 = vpop.eup %395  ;;  %v274_v32 = vpack.c.bf16 %v392_v27, %v394_v30 }
  0xc8   :  { %v398_v34 = vpop.eup %397 }
  0xc9   :  { %v273_v35 = vpack.c.bf16 %v398_v34, %v396_v31  ;;  %v400_v36 = vpop.eup %399 }
  0xca   :  { %v402_v37 = vpop.eup %401 }
  0xcb   :  { %286 = vmatpush.bf16.msra.mxu1 %v275_v26  ;;  %v272_v38 = vpack.c.bf16 %v400_v36, %v402_v37 }
  0xcf   :  { %287 = vmatpush.bf16.msra.mxu1 %v274_v32 }
  0xd3   :  { %288 = vmatpush.bf16.msra.mxu1 %v273_v35 }
  0xd7   :  { %289 = vmatpush.bf16.msra.mxu1 %v272_v38 }
  0xda   :  { %290 = vmatmul.bf16.vlgmr.msra.gmra.mxu1 %v271_v33 }
 0x157   :  { %v291_v39 = vpop.f32.mrf.mxu1 }
 0x158   :  { %v292_v40 = vadd.f32 %v291_v39, %v281_v29 }
 0x15a   :  { %v355_v41 = vclamps-f32 %v292_v40, 10.0 }
 0x15c   :  { %298 = vst.msk [vmem:[#allocation3] sm:$0x1] %vm297_vm1, %v355_v41 }
 0x15d   :  { %309 = dma.vmem_to_hbm [thread:$0]  %s305_s21, 16, %s307_s24, [#allocation4]  }
 0x15f   :  { %v293_v42 = vpop.f32.mrf.mxu1 }
 0x160   :  { %427 = dma.done.wait [#allocation4], 16  }
 0x161   :  { %428 = vsyncadd [#allocation4], 4294967280 }
 0x162   :  { %314 = vsyncpa [#allocation4], 1 }

</bundles_post_ra>
